<compile_context>
chip_gen: v6e
topology: v6e:2x2x1
jax: 0.10.0
libtpu: 0.0.40
codegen_flags: <defaults>
</compile_context>

<pallas_src>
import functools

import jax
import jax.numpy as jnp
from jax.experimental import pallas as pl
from jax.experimental.pallas import tpu as pltpu


def _round_up(n, m):
    return ((n + m - 1) // m) * m


def _mlp_kernel(n_hidden, *refs):
    """Fused MLP forward for one batch tile.

    refs layout:
      x_ref                       bf16 (TM, F)
      [w_i bf16 (in,out), b_i f32 (1,out)] * n_hidden
      w_last_row f32 (1, H_last), b_last f32 (1, 1)
      o_ref                       f32  (TM, 1)
    Hidden layers: MXU bf16 matmul with f32 accumulation, bias add + ReLU in f32.
    Final Linear(H_last -> 1): VPU multiply + reduce (no MXU), f32 throughout.
    """
    x_ref = refs[0]
    o_ref = refs[-1]
    w_last_ref = refs[-3]
    b_last_ref = refs[-2]

    h = x_ref[...]                          # bf16 activations (MXU-native input)
    for i in range(n_hidden):
        w = refs[1 + 2 * i][...]            # bf16 (in, out)
        b = refs[2 + 2 * i][...]            # f32  (1, out) -> broadcasts over batch
        h = jnp.maximum(
            jnp.dot(h, w, preferred_element_type=jnp.float32) + b, 0.0)
        if i < n_hidden - 1:
            h = h.astype(jnp.bfloat16)      # narrow only at the next MXU input

    # Final Linear(H_last -> 1) on the VPU/XLU: (TM,H) * (1,H) -> reduce(-1)
    h = h.astype(jnp.float32)
    out = jnp.sum(h * w_last_ref[...], axis=-1, keepdims=True) + b_last_ref[...]
    o_ref[...] = out.astype(o_ref.dtype)


def init_network_params(key, input_size, hidden_layers):
    """Deterministic init mimicking nn.Linear's U(-1/sqrt(in), 1/sqrt(in))."""
    dims = [input_size] + list(hidden_layers) + [1]
    weights, biases = [], []
    for i in range(len(dims) - 1):
        fan_in, fan_out = dims[i], dims[i + 1]
        key, kw, kb = jax.random.split(key, 3)
        bound = 1.0 / jnp.sqrt(jnp.float32(fan_in))
        # stored as (in, out) so the kernel does h @ W + b
        w = jax.random.uniform(kw, (fan_in, fan_out), jnp.float32, -bound, bound)
        b = jax.random.uniform(kb, (1, fan_out), jnp.float32, -bound, bound)
        weights.append(w)
        biases.append(b)
    return weights, biases


def network_forward(x, weights, biases):
    """Equivalent of Network.forward: flatten -> (Linear/ReLU)* -> Linear(1) -> flatten.

    Batch-tiled 1-D grid: x/out are tiled over the batch (double-buffered auto
    pipeline), weights/biases keep index_map (0,0) so they stay VMEM-resident
    across grid steps. Batch is padded in the wrapper so no tail masking is needed.
    """
    B = x.shape[0]
    xf = x.reshape(B, -1)
    F = xf.shape[1]
    n_layers = len(weights)
    n_hidden = n_layers - 1

    # Batch tile: sublane-friendly (multiple of 16 for bf16), capped at 512.
    TM = _round_up(B, 16) if B <= 512 else 512
    B_pad = _round_up(B, TM)

    xf = xf.astype(jnp.bfloat16)            # halve HBM traffic on the big input
    if B_pad != B:
        xf = jnp.pad(xf, ((0, B_pad - B), (0, 0)))

    grid = (B_pad // TM,)

    args = [xf]
    in_specs = [pl.BlockSpec((TM, F), lambda i: (i, 0))]

    # Hidden Linear+ReLU layers: bf16 weights (MXU input), f32 biases. Resident.
    for li in range(n_hidden):
        w = weights[li].astype(jnp.bfloat16)
        b = biases[li].astype(jnp.float32)
        args += [w, b]
        in_specs += [
            pl.BlockSpec(w.shape, lambda i: (0, 0)),
            pl.BlockSpec(b.shape, lambda i: (0, 0)),
        ]

    # Final Linear(H_last -> 1): pass W^T as a (1, H_last) f32 row for the VPU path.
    w_last = weights[-1].astype(jnp.float32).T          # (1, H_last)
    b_last = biases[-1].astype(jnp.float32).reshape(1, 1)
    args += [w_last, b_last]
    in_specs += [
        pl.BlockSpec(w_last.shape, lambda i: (0, 0)),
        pl.BlockSpec(b_last.shape, lambda i: (0, 0)),
    ]

    # Advisory cost estimate for XLA's scheduler.
    flops = 0
    d_in = F
    for li in range(n_hidden):
        d_out = weights[li].shape[1]
        flops += 2 * B_pad * d_in * d_out
        d_in = d_out
    flops += 2 * B_pad * d_in                            # final H_last -> 1
    bytes_accessed = xf.size * xf.dtype.itemsize + B_pad * 4
    for a in args[1:]:
        bytes_accessed += a.size * a.dtype.itemsize
    cost = pl.CostEstimate(flops=flops, transcendentals=0,
                           bytes_accessed=bytes_accessed)

    # VMEM budget: 2x double-buffered x tile + resident params + 2x out tile.
    param_bytes = sum(a.size * a.dtype.itemsize for a in args[1:])
    needed = 2 * (TM * F * 2) + param_bytes + 2 * (TM * 4)
    vmem_limit = int(min(48 << 20, max(needed + (2 << 20), 4 << 20)))

    kernel = functools.partial(_mlp_kernel, n_hidden)
    out = pl.pallas_call(
        kernel,
        out_shape=jax.ShapeDtypeStruct((B_pad, 1), jnp.float32),
        grid=grid,
        in_specs=in_specs,
        out_specs=pl.BlockSpec((TM, 1), lambda i: (i, 0)),
        compiler_params=pltpu.CompilerParams(
            dimension_semantics=("parallel",),    # shard batch tiles across TCs (v7x)
            vmem_limit_bytes=vmem_limit,
        ),
        cost_estimate=cost,
    )(*args)

    # Drop batch padding; torch.flatten(...) on (B, 1) -> (B,)
    return out[:B, 0]


def reference_forward(x, weights, biases):
    """Pure-JAX reference following the same bf16-input / f32-accumulate path."""
    B = x.shape[0]
    n_hidden = len(weights) - 1
    h = x.reshape(B, -1).astype(jnp.bfloat16)
    for i in range(n_hidden):
        w = weights[i].astype(jnp.bfloat16)
        b = biases[i].astype(jnp.float32)
        h = jnp.maximum(jnp.dot(h, w, preferred_element_type=jnp.float32) + b, 0.0)
        if i < n_hidden - 1:
            h = h.astype(jnp.bfloat16)
    h = h.astype(jnp.float32)
    out = h @ weights[-1].astype(jnp.float32) + biases[-1].astype(jnp.float32)
    return out.reshape(-1)


if __name__ == "__main__":
    key = jax.random.PRNGKey(0)
    k_x, k_p = jax.random.split(key)

    # Small example consistent with the module: batch=2, channels=4, spatial=16x16
    B, C, H, W = 2, 4, 16, 16
    x = jax.random.normal(k_x, (B, C, H, W), jnp.float32)

    input_size = C * H * W          # 1024
    hidden_layers = [32, 32]
    weights, biases = init_network_params(k_p, input_size, hidden_layers)

    out = network_forward(x, weights, biases)
    out = jax.block_until_ready(out)

    ref = reference_forward(x, weights, biases)
    assert out.shape == (B,), f"unexpected output shape {out.shape}"
    assert jnp.allclose(out, ref, atol=1e-3, rtol=1e-3), "mismatch vs reference"

    print("KERNEL_OK")
</pallas_src>

<mosaic_0001>
module attributes {stable_mosaic.version = 11 : i64} {
  func.func @_mlp_kernel(%arg0: i32, %arg1: memref<16x1024xbf16, #tpu.memory_space<vmem>>, %arg2: memref<1024x32xbf16, #tpu.memory_space<vmem>>, %arg3: memref<1x32xf32, #tpu.memory_space<vmem>>, %arg4: memref<32x32xbf16, #tpu.memory_space<vmem>>, %arg5: memref<1x32xf32, #tpu.memory_space<vmem>>, %arg6: memref<1x32xf32, #tpu.memory_space<vmem>>, %arg7: memref<1x1xf32, #tpu.memory_space<vmem>>, %arg8: memref<16x1xf32, #tpu.memory_space<vmem>>) attributes {dimension_semantics = [#tpu.dimension_semantics<parallel>], iteration_bounds = array<i64: 1>, scalar_prefetch = 0 : i64, scratch_operands = 0 : i64, tpu.core_type = #tpu.core_type<tc>, window_params = [{transform_indices = @transform_0, window_bounds = array<i64: 16, 1024>}, {pipeline_mode = #tpu.pipeline_mode<synchronous>, transform_indices = @transform_1, window_bounds = array<i64: 1024, 32>}, {pipeline_mode = #tpu.pipeline_mode<synchronous>, transform_indices = @transform_2, window_bounds = array<i64: 1, 32>}, {pipeline_mode = #tpu.pipeline_mode<synchronous>, transform_indices = @transform_3, window_bounds = array<i64: 32, 32>}, {pipeline_mode = #tpu.pipeline_mode<synchronous>, transform_indices = @transform_4, window_bounds = array<i64: 1, 32>}, {pipeline_mode = #tpu.pipeline_mode<synchronous>, transform_indices = @transform_5, window_bounds = array<i64: 1, 32>}, {pipeline_mode = #tpu.pipeline_mode<synchronous>, transform_indices = @transform_6, window_bounds = array<i64: 1, 1>}, {transform_indices = @transform_7, window_bounds = array<i64: 16, 1>}]} {
    %c0 = arith.constant 0 : index
    %c0_0 = arith.constant 0 : index
    %0 = vector.load %arg1[%c0, %c0_0] : memref<16x1024xbf16, #tpu.memory_space<vmem>>, vector<16x1024xbf16>
    %c0_1 = arith.constant 0 : index
    %c0_2 = arith.constant 0 : index
    %1 = vector.load %arg2[%c0_1, %c0_2] : memref<1024x32xbf16, #tpu.memory_space<vmem>>, vector<1024x32xbf16>
    %c0_3 = arith.constant 0 : index
    %c0_4 = arith.constant 0 : index
    %2 = vector.load %arg3[%c0_3, %c0_4] : memref<1x32xf32, #tpu.memory_space<vmem>>, vector<1x32xf32>
    %cst = arith.constant dense<0.000000e+00> : vector<16x32xf32>
    %3 = tpu.matmul %0, %1, %cst {dimension_numbers = #tpu.dot_dimension_numbers<[1], [0], [0], [1], [0, 0, 1, 1], [], []>} : vector<16x1024xbf16>, vector<1024x32xbf16>, vector<16x32xf32> -> vector<16x32xf32>
    %4 = vector.broadcast %2 : vector<1x32xf32> to vector<16x32xf32>
    %5 = arith.addf %3, %4 : vector<16x32xf32>
    %cst_5 = arith.constant 0.000000e+00 : f32
    %6 = vector.broadcast %cst_5 : f32 to vector<16x32xf32>
    %7 = arith.maximumf %5, %6 : vector<16x32xf32>
    %8 = arith.truncf %7 : vector<16x32xf32> to vector<16x32xbf16>
    %c0_6 = arith.constant 0 : index
    %c0_7 = arith.constant 0 : index
    %9 = vector.load %arg4[%c0_6, %c0_7] : memref<32x32xbf16, #tpu.memory_space<vmem>>, vector<32x32xbf16>
    %c0_8 = arith.constant 0 : index
    %c0_9 = arith.constant 0 : index
    %10 = vector.load %arg5[%c0_8, %c0_9] : memref<1x32xf32, #tpu.memory_space<vmem>>, vector<1x32xf32>
    %cst_10 = arith.constant dense<0.000000e+00> : vector<16x32xf32>
    %11 = tpu.matmul %8, %9, %cst_10 {dimension_numbers = #tpu.dot_dimension_numbers<[1], [0], [0], [1], [0, 0, 1, 1], [], []>} : vector<16x32xbf16>, vector<32x32xbf16>, vector<16x32xf32> -> vector<16x32xf32>
    %12 = vector.broadcast %10 : vector<1x32xf32> to vector<16x32xf32>
    %13 = arith.addf %11, %12 : vector<16x32xf32>
    %cst_11 = arith.constant 0.000000e+00 : f32
    %14 = vector.broadcast %cst_11 : f32 to vector<16x32xf32>
    %15 = arith.maximumf %13, %14 : vector<16x32xf32>
    %c0_12 = arith.constant 0 : index
    %c0_13 = arith.constant 0 : index
    %16 = vector.load %arg6[%c0_12, %c0_13] : memref<1x32xf32, #tpu.memory_space<vmem>>, vector<1x32xf32>
    %17 = vector.broadcast %16 : vector<1x32xf32> to vector<16x32xf32>
    %18 = arith.mulf %15, %17 : vector<16x32xf32>
    %cst_14 = arith.constant dense<0.000000e+00> : vector<16xf32>
    %19 = vector.multi_reduction <add>, %18, %cst_14 [1] : vector<16x32xf32> to vector<16xf32>
    %20 = vector.shape_cast %19 : vector<16xf32> to vector<16x1xf32>
    %c0_15 = arith.constant 0 : index
    %c0_16 = arith.constant 0 : index
    %21 = vector.load %arg7[%c0_15, %c0_16] : memref<1x1xf32, #tpu.memory_space<vmem>>, vector<1x1xf32>
    %22 = vector.broadcast %21 : vector<1x1xf32> to vector<16x1xf32>
    %23 = arith.addf %20, %22 : vector<16x1xf32>
    %c0_17 = arith.constant 0 : index
    %c0_18 = arith.constant 0 : index
    %24 = vector.load %arg8[%c0_17, %c0_18] : memref<16x1xf32, #tpu.memory_space<vmem>>, vector<16x1xf32>
    tpu.vector_store %arg8[%c0_17, %c0_18], %23 {strides = array<i32>} : memref<16x1xf32, #tpu.memory_space<vmem>>, vector<16x1xf32>,
    return
  }
  func.func @transform_0(%arg0: i32) -> (i32, i32) {
    %c0_i32 = arith.constant 0 : i32
    %c0_i32_0 = arith.constant 0 : i32
    return %arg0, %c0_i32 : i32, i32
  }
  func.func @transform_1(%arg0: i32) -> (i32, i32) {
    %c0_i32 = arith.constant 0 : i32
    %c0_i32_0 = arith.constant 0 : i32
    %c0_i32_1 = arith.constant 0 : i32
    return %c0_i32, %c0_i32_0 : i32, i32
  }
  func.func @transform_2(%arg0: i32) -> (i32, i32) {
    %c0_i32 = arith.constant 0 : i32
    %c0_i32_0 = arith.constant 0 : i32
    %c0_i32_1 = arith.constant 0 : i32
    return %c0_i32, %c0_i32_0 : i32, i32
  }
  func.func @transform_3(%arg0: i32) -> (i32, i32) {
    %c0_i32 = arith.constant 0 : i32
    %c0_i32_0 = arith.constant 0 : i32
    %c0_i32_1 = arith.constant 0 : i32
    return %c0_i32, %c0_i32_0 : i32, i32
  }
  func.func @transform_4(%arg0: i32) -> (i32, i32) {
    %c0_i32 = arith.constant 0 : i32
    %c0_i32_0 = arith.constant 0 : i32
    %c0_i32_1 = arith.constant 0 : i32
    return %c0_i32, %c0_i32_0 : i32, i32
  }
  func.func @transform_5(%arg0: i32) -> (i32, i32) {
    %c0_i32 = arith.constant 0 : i32
    %c0_i32_0 = arith.constant 0 : i32
    %c0_i32_1 = arith.constant 0 : i32
    return %c0_i32, %c0_i32_0 : i32, i32
  }
  func.func @transform_6(%arg0: i32) -> (i32, i32) {
    %c0_i32 = arith.constant 0 : i32
    %c0_i32_0 = arith.constant 0 : i32
    %c0_i32_1 = arith.constant 0 : i32
    return %c0_i32, %c0_i32_0 : i32, i32
  }
  func.func @transform_7(%arg0: i32) -> (i32, i32) {
    %c0_i32 = arith.constant 0 : i32
    %c0_i32_0 = arith.constant 0 : i32
    return %arg0, %c0_i32 : i32, i32
  }
}

</mosaic_0001>

<bundles_post_ra>
// kernel: tpu_custom_call.1
= control target key start
LH: loop header
LB: loop body
LE: loop exit
PB: predicated region body
PF: predicated region fallthrough
CT: control target
= control target key end

     0   :  { %vm1111_vm0 = vmmov 0   ;;  %vm786_vm1 = vcmask 261120   ;;  %vm857_vm2 = vcmask 7168   ;;  %s1395_s1 = inlined_call_operand.vmem [shape: bf16[1024,32], index: 1, kind: input, shape index: {}]   ;;  %s1396_s0 = inlined_call_operand.vmem [shape: bf16[16,1024], index: 0, kind: input, shape index: {}]   ;;  %s1397_s3 = inlined_call_operand.vmem [shape: bf16[32,32], index: 3, kind: input, shape index: {}]   ;;  %s1398_s2 = inlined_call_operand.vmem [shape: f32[1,32], index: 2, kind: input, shape index: {}]   ;;  %s1399_s6 = inlined_call_operand.<no memory space> [shape: f32[1,1], index: 6, kind: input, shape index: {}]   ;;  %s1400_s4 = inlined_call_operand.vmem [shape: f32[1,32], index: 4, kind: input, shape index: {}]   ;;  %s1401_s5 = inlined_call_operand.vmem [shape: f32[1,32], index: 5, kind: input, shape index: {}]   ;;  %s1402_s7 = inlined_call_operand.vmem [shape: f32[16,1], index: 7, kind: output, shape index: {}]  }
   0x1   :  { %v1044_v0 = vld [vmem:[%s1395_s1 + $0x78] sm:$0xff]   ;;  %v1048_v4 = vld [vmem:[%s1395_s1 + $0x70] sm:$0xff]   ;;  %v1052_v8 = vld [vmem:[%s1395_s1 + $0x68] sm:$0xff]  }
   0x2   :  { %v1045_v1 = vld [vmem:[%s1395_s1 + $0xf8] sm:$0xff]   ;;  %943 = vmatprep.subr.bf16.mxu0 %v1044_v0  ;;  %v1049_v5 = vld [vmem:[%s1395_s1 + $0xf0] sm:$0xff]   ;;  %v1053_v9 = vld [vmem:[%s1395_s1 + $0xe8] sm:$0xff]  }
   0x3   :  { %v1046_v2 = vld [vmem:[%s1395_s1 + $0x38] sm:$0xff]   ;;  %965 = vmatprep.subr.bf16.mxu1 %v1045_v1  ;;  %v1050_v6 = vld [vmem:[%s1395_s1 + $0x30] sm:$0xff]   ;;  %v1054_v10 = vld [vmem:[%s1395_s1 + $0x28] sm:$0xff]  }
   0x4   :  { %v1047_v3 = vld [vmem:[%s1395_s1 + $0xb8] sm:$0xff]   ;;  %944 = vmatpush3.bf16.msra.mxu0 %v1046_v2  ;;  %v1051_v7 = vld [vmem:[%s1395_s1 + $0xb0] sm:$0xff]   ;;  %v1055_v11 = vld [vmem:[%s1395_s1 + $0xa8] sm:$0xff]  }
   0x5   :  { %966 = vmatpush3.bf16.msra.mxu1 %v1047_v3  ;;  %945 = vmatprep.subr.bf16.mxu0 %v1048_v4  ;;  %v1056_v12 = vld [vmem:[%s1395_s1 + $0x60] sm:$0xff]   ;;  %v1060_v16 = vld [vmem:[%s1395_s1 + $0x58] sm:$0xff]   ;;  %v1064_v20 = vld [vmem:[%s1395_s1 + $0x50] sm:$0xff]  }
   0x6   :  { %967 = vmatprep.subr.bf16.mxu1 %v1049_v5  ;;  %v1057_v13 = vld [vmem:[%s1395_s1 + $0xe0] sm:$0xff]   ;;  %v1061_v17 = vld [vmem:[%s1395_s1 + $0xd8] sm:$0xff]   ;;  %v1065_v21 = vld [vmem:[%s1395_s1 + $0xd0] sm:$0xff]  }
   0x7   :  { %v1058_v14 = vld [vmem:[%s1395_s1 + $0x20] sm:$0xff]   ;;  %v1062_v18 = vld [vmem:[%s1395_s1 + $0x18] sm:$0xff]   ;;  %v1066_v22 = vld [vmem:[%s1395_s1 + $0x10] sm:$0xff]  }
   0x8   :  { %946 = vmatpush3.bf16.msra.mxu0 %v1050_v6  ;;  %v1059_v15 = vld [vmem:[%s1395_s1 + $0xa0] sm:$0xff]   ;;  %v1063_v19 = vld [vmem:[%s1395_s1 + $0x98] sm:$0xff]   ;;  %v1067_v23 = vld [vmem:[%s1395_s1 + $0x90] sm:$0xff]  }
   0x9   :  { %968 = vmatpush3.bf16.msra.mxu1 %v1051_v7  ;;  %947 = vmatprep.subr.bf16.mxu0 %v1052_v8  ;;  %v1068_v24 = vld [vmem:[%s1395_s1 + $0x48] sm:$0xff]   ;;  %v1072_v28 = vld [vmem:[%s1395_s1 + $0x40] sm:$0xff]   ;;  %v1076_v40 = vld [vmem:[%s1395_s1 + $0x178] sm:$0xff]  }
   0xa   :  { %969 = vmatprep.subr.bf16.mxu1 %v1053_v9  ;;  %v1069_v25 = vld [vmem:[%s1395_s1 + $0xc8] sm:$0xff]   ;;  %v1073_v29 = vld [vmem:[%s1395_s1 + $0xc0] sm:$0xff]   ;;  %v1077_v41 = vld [vmem:[%s1395_s1 + $0x1f8] sm:$0xff]  }
   0xb   :  { %v1070_v26 = vld [vmem:[%s1395_s1 + $0x8] sm:$0xff]   ;;  %v1074_v30 = vld [vmem:[%s1395_s1] sm:$0xff]   ;;  %v1078_v42 = vld [vmem:[%s1395_s1 + $0x138] sm:$0xff]  }
   0xc   :  { %948 = vmatpush3.bf16.msra.mxu0 %v1054_v10  ;;  %v1071_v27 = vld [vmem:[%s1395_s1 + $0x88] sm:$0xff]   ;;  %v1075_v31 = vld [vmem:[%s1395_s1 + $0x80] sm:$0xff]   ;;  %v1079_v43 = vld [vmem:[%s1395_s1 + $0x1b8] sm:$0xff]  }
   0xd   :  { %970 = vmatpush3.bf16.msra.mxu1 %v1055_v11  ;;  %949 = vmatprep.subr.bf16.mxu0 %v1056_v12  ;;  %v29_v32 = vld [vmem:[%s1396_s0] sm:$0xff]  ;;  %v30_v34 = vld [vmem:[%s1396_s0 + $0x8] sm:$0xff]  ;;  %v1080_v44 = vld [vmem:[%s1395_s1 + $0x170] sm:$0xff]  }
   0xe   :  { %971 = vmatprep.subr.bf16.mxu1 %v1057_v13  ;;  %v33_v33 = vld [vmem:[%s1396_s0 + $0x20] sm:$0xff]  ;;  %v34_v37 = vld [vmem:[%s1396_s0 + $0x28] sm:$0xff]  ;;  %v1081_v45 = vld [vmem:[%s1395_s1 + $0x1f0] sm:$0xff]  }
   0xf   :  { %v865_v35 = vcombine.low %v29_v32, %v33_v33  ;;  %v866_v36 = vcombine.high %v29_v32, %v33_v33  ;;  %v867_v38 = vcombine.low %v30_v34, %v34_v37  ;;  %v868_v39 = vcombine.high %v30_v34, %v34_v37  ;;  %v1082_v46 = vld [vmem:[%s1395_s1 + $0x130] sm:$0xff]   ;;  %v1084_v48 = vld [vmem:[%s1395_s1 + $0x168] sm:$0xff]   ;;  %v1088_v52 = vld [vmem:[%s1395_s1 + $0x160] sm:$0xff]  }
  0x10   :  { %950 = vmatpush3.bf16.msra.mxu0 %v1058_v14  ;;  %v1083_v47 = vld [vmem:[%s1395_s1 + $0x1b0] sm:$0xff]   ;;  %v1085_v49 = vld [vmem:[%s1395_s1 + $0x1e8] sm:$0xff]   ;;  %v1089_v53 = vld [vmem:[%s1395_s1 + $0x1e0] sm:$0xff]  }
  0x11   :  { %972 = vmatpush3.bf16.msra.mxu1 %v1059_v15  ;;  %951 = vmatprep.subr.bf16.mxu0 %v1060_v16  ;;  %v1086_v50 = vld [vmem:[%s1395_s1 + $0x128] sm:$0xff]   ;;  %v1090_v54 = vld [vmem:[%s1395_s1 + $0x120] sm:$0xff]   ;;  %v1092_v56 = vld [vmem:[%s1395_s1 + $0x158] sm:$0xff]  }
  0x12   :  { %973 = vmatprep.subr.bf16.mxu1 %v1061_v17  ;;  %628 = vmatprep.mubr.bf16.mxu0 %v866_v36  ;;  %v1087_v51 = vld [vmem:[%s1395_s1 + $0x1a8] sm:$0xff]   ;;  %v1091_v55 = vld [vmem:[%s1395_s1 + $0x1a0] sm:$0xff]   ;;  %v1093_v57 = vld [vmem:[%s1395_s1 + $0x1d8] sm:$0xff]   ;;  %v1110_v17 = vmov 0.0  }
  0x13   :  { %669 = vmatprep.mubr.bf16.mxu1 %v868_v39  ;;  %v1094_v58 = vld [vmem:[%s1395_s1 + $0x118] sm:$0xff]   ;;  %v1096_v60 = vld [vmem:[%s1395_s1 + $0x150] sm:$0xff]   ;;  %v1100_v0 = vld [vmem:[%s1395_s1 + $0x148] sm:$0xff]  }
  0x14   :  { %952 = vmatpush3.bf16.msra.mxu0 %v1062_v18  ;;  %v1095_v59 = vld [vmem:[%s1395_s1 + $0x198] sm:$0xff]   ;;  %v1097_v61 = vld [vmem:[%s1395_s1 + $0x1d0] sm:$0xff]   ;;  %v1101_v1 = vld [vmem:[%s1395_s1 + $0x1c8] sm:$0xff]  }
  0x15   :  { %974 = vmatpush3.bf16.msra.mxu1 %v1063_v19  ;;  %953 = vmatprep.subr.bf16.mxu0 %v1064_v20  ;;  %v1098_v62 = vld [vmem:[%s1395_s1 + $0x110] sm:$0xff]   ;;  %v1102_v2 = vld [vmem:[%s1395_s1 + $0x108] sm:$0xff]   ;;  %v1104_v4 = vld [vmem:[%s1395_s1 + $0x140] sm:$0xff]  }
  0x16   :  { %975 = vmatprep.subr.bf16.mxu1 %v1065_v21  ;;  %v1099_v63 = vld [vmem:[%s1395_s1 + $0x190] sm:$0xff]   ;;  %v1103_v3 = vld [vmem:[%s1395_s1 + $0x188] sm:$0xff]   ;;  %v1105_v5 = vld [vmem:[%s1395_s1 + $0x1c0] sm:$0xff]  }
  0x17   :  { %v1106_v6 = vld [vmem:[%s1395_s1 + $0x100] sm:$0xff]   ;;  %v31_v8 = vld [vmem:[%s1396_s0 + $0x10] sm:$0xff]  ;;  %v32_v12 = vld [vmem:[%s1396_s0 + $0x18] sm:$0xff] }
  0x18   :  { %954 = vmatpush3.bf16.msra.mxu0 %v1066_v22  ;;  %v1107_v7 = vld [vmem:[%s1395_s1 + $0x180] sm:$0xff]   ;;  %v35_v9 = vld [vmem:[%s1396_s0 + $0x30] sm:$0xff]  ;;  %v36_v13 = vld [vmem:[%s1396_s0 + $0x38] sm:$0xff] }
  0x19   :  { %976 = vmatpush3.bf16.msra.mxu1 %v1067_v23  ;;  %955 = vmatprep.subr.bf16.mxu0 %v1068_v24  ;;  %v869_v10 = vcombine.low %v31_v8, %v35_v9  ;;  %v870_v11 = vcombine.high %v31_v8, %v35_v9  ;;  %v871_v14 = vcombine.low %v32_v12, %v36_v13  ;;  %v1108_v16 = vld [vmem:[%s1397_s3 + $0x8] sm:$0xff]   ;;  %v1109_v18 = vld [vmem:[%s1397_s3] sm:$0xff]  }
  0x1a   :  { %977 = vmatprep.subr.bf16.mxu1 %v1069_v25  ;;  %v872_v15 = vcombine.high %v32_v12, %v36_v13 }
  0x1c   :  { %956 = vmatpush3.bf16.msra.mxu0 %v1070_v26  ;;  %v864_v26 = vld [vmem:[%s1398_s2] ss:$0 sm:$0xff] }
  0x1d   :  { %978 = vmatpush3.bf16.msra.mxu1 %v1071_v27  ;;  %957 = vmatprep.subr.bf16.mxu0 %v1072_v28 }
  0x1e   :  { %979 = vmatprep.subr.bf16.mxu1 %v1073_v29 }
  0x20   :  { %958 = vmatpush3.bf16.msra.mxu0 %v1074_v30 }
  0x21   :  { %980 = vmatpush3.bf16.msra.mxu1 %v1075_v31  ;;  %987 = vmatprep.subr.bf16.mxu0 %v1076_v40 }
  0x22   :  { %1009 = vmatprep.subr.bf16.mxu1 %v1077_v41 }
  0x23   :  { %629 = vmatmul.mubr.bf16.vlgmr.msra.gmra.mxu0 %v865_v35 }
  0x24   :  { %670 = vmatmul.mubr.bf16.vlgmr.msra.gmra.mxu1 %v867_v38  ;;  %988 = vmatpush3.bf16.msra.mxu0 %v1078_v42 }
  0x25   :  { %1010 = vmatpush3.bf16.msra.mxu1 %v1079_v43  ;;  %989 = vmatprep.subr.bf16.mxu0 %v1080_v44 }
  0x26   :  { %1011 = vmatprep.subr.bf16.mxu1 %v1081_v45  ;;  %710 = vmatprep.mubr.bf16.mxu0 %v870_v11 }
  0x27   :  { %751 = vmatprep.mubr.bf16.mxu1 %v872_v15 }
  0x28   :  { %990 = vmatpush3.bf16.msra.mxu0 %v1082_v46 }
  0x29   :  { %1012 = vmatpush3.bf16.msra.mxu1 %v1083_v47  ;;  %991 = vmatprep.subr.bf16.mxu0 %v1084_v48 }
  0x2a   :  { %1013 = vmatprep.subr.bf16.mxu1 %v1085_v49 }
  0x2c   :  { %992 = vmatpush3.bf16.msra.mxu0 %v1086_v50 }
  0x2d   :  { %1014 = vmatpush3.bf16.msra.mxu1 %v1087_v51  ;;  %993 = vmatprep.subr.bf16.mxu0 %v1088_v52 }
  0x2e   :  { %1015 = vmatprep.subr.bf16.mxu1 %v1089_v53 }
  0x30   :  { %994 = vmatpush3.bf16.msra.mxu0 %v1090_v54 }
  0x31   :  { %1016 = vmatpush3.bf16.msra.mxu1 %v1091_v55  ;;  %995 = vmatprep.subr.bf16.mxu0 %v1092_v56  ;;  %v12_v55 = vstv %s1399_s6  ;;  %v937_v56 = vld [vmem:[%s1400_s4] ss:$0 sm:$0xff] }
  0x32   :  { %1017 = vmatprep.subr.bf16.mxu1 %v1093_v57  ;;  %13 = vst [vmem:[#allocation2] sm:$0x1] %v12_v55 }
  0x34   :  { %996 = vmatpush3.bf16.msra.mxu0 %v1094_v58 }
  0x35   :  { %1018 = vmatpush3.bf16.msra.mxu1 %v1095_v59  ;;  %997 = vmatprep.subr.bf16.mxu0 %v1096_v60  ;;  %v941_v60 = vld [vmem:[%s1401_s5] ss:$0 sm:$0xff] }
  0x36   :  { %1019 = vmatprep.subr.bf16.mxu1 %v1097_v61 }
  0x38   :  { %998 = vmatpush3.bf16.msra.mxu0 %v1098_v62 }
  0x39   :  { %1020 = vmatpush3.bf16.msra.mxu1 %v1099_v63  ;;  %999 = vmatprep.subr.bf16.mxu0 %v1100_v0 }
  0x3a   :  { %1021 = vmatprep.subr.bf16.mxu1 %v1101_v1 }
  0x3c   :  { %1000 = vmatpush3.bf16.msra.mxu0 %v1102_v2 }
  0x3d   :  { %1022 = vmatpush3.bf16.msra.mxu1 %v1103_v3  ;;  %1001 = vmatprep.subr.bf16.mxu0 %v1104_v4 }
  0x3e   :  { %1023 = vmatprep.subr.bf16.mxu1 %v1105_v5 }
  0x40   :  { %1002 = vmatpush3.bf16.msra.mxu0 %v1106_v6  ;;  %v942_v6 = vld [vmem:[#allocation2] ss:$0 sm:$0xff] }
  0x41   :  { %1024 = vmatpush3.bf16.msra.mxu1 %v1107_v7  ;;  %1034 = vmatprep.subr.bf16.mxu0 %v1110_v17 }
  0x43   :  { %711 = vmatmul.mubr.bf16.vlgmr.msra.gmra.mxu0 %v869_v10 }
  0x44   :  { %752 = vmatmul.mubr.bf16.vlgmr.msra.gmra.mxu1 %v871_v14  ;;  %1035 = vmatpush3.bf16.msra.mxu0 %v1108_v16 }
  0x45   :  { %1036 = vmatprep.subr.bf16.mxu0 %v1110_v17  ;;  %1038 = vmatprep.mubr.msk.bf16.mxu0 %vm1111_vm0, %v1110_v17 }
  0x48   :  { %1037 = vmatpush3.bf16.msra.mxu0 %v1109_v18 }
  0xe3   :  { %v959_v19 = vpop.f32.mrf.mxu0 }
  0xe4   :  { %v981_v20 = vpop.f32.mrf.mxu1 }
  0xe5   :  { %v960_v21 = vpop.f32.mrf.mxu0 }
  0xe6   :  { %v982_v22 = vpop.f32.mrf.mxu1  ;;  %v961_v24 = vadd.f32 %v960_v21, %v959_v19 }
  0xe7   :  { %v962_v23 = vpop.f32.mrf.mxu0  ;;  %v983_v29 = vadd.f32 %v982_v22, %v981_v20 }
  0xe8   :  { %v984_v25 = vpop.f32.mrf.mxu1  ;;  %v631_v28 = vadd.f32 %v961_v24, %v864_v26 }
  0xe9   :  { %v963_v27 = vpop.f32.mrf.mxu0 }
  0xea   :  { %v964_v30 = vadd.f32 %v963_v27, %v962_v23  ;;  %v985_v31 = vpop.f32.mrf.mxu1  ;;  %v672_v35 = vadd.f32 %v983_v29, %v631_v28 }
  0xeb   :  { %v986_v40 = vadd.f32 %v985_v31, %v984_v25 }
  0xec   :  { %v634_v36 = vadd.f32 %v964_v30, %v864_v26 }
  0xee   :  { %v675_v44 = vadd.f32 %v986_v40, %v634_v36 }
 0x103   :  { %v1003_v32 = vpop.f32.mrf.mxu0 }
 0x104   :  { %v1025_v33 = vpop.f32.mrf.mxu1 }
 0x105   :  { %v1004_v34 = vpop.f32.mrf.mxu0 }
 0x106   :  { %v1005_v37 = vadd.f32 %v1004_v34, %v1003_v32  ;;  %v1026_v38 = vpop.f32.mrf.mxu1 }
 0x107   :  { %v1006_v39 = vpop.f32.mrf.mxu0  ;;  %v1027_v45 = vadd.f32 %v1026_v38, %v1025_v33 }
 0x108   :  { %v713_v41 = vadd.f32 %v1005_v37, %v672_v35  ;;  %v1028_v42 = vpop.f32.mrf.mxu1 }
 0x109   :  { %v1007_v43 = vpop.f32.mrf.mxu0 }
 0x10a   :  { %v1008_v46 = vadd.f32 %v1007_v43, %v1006_v39  ;;  %v1029_v47 = vpop.f32.mrf.mxu1  ;;  %v754_v48 = vadd.f32 %v1027_v45, %v713_v41 }
 0x10b   :  { %v1030_v50 = vadd.f32 %v1029_v47, %v1028_v42 }
 0x10c   :  { %v716_v49 = vadd.f32 %v1008_v46, %v675_v44  ;;  %v760_v52 = vmax.f32 %v754_v48, 0.0 }
 0x10e   :  { %v757_v51 = vadd.f32 %v1030_v50, %v716_v49 }
 0x110   :  { %v761_v53 = vmax.f32 %v757_v51, 0.0 }
 0x112   :  { %v762_v54 = vpack.c.bf16 %v761_v53, %v760_v52 }
 0x114   :  { %1039 = vmatmul.mubr.msk.bf16.vlgmr.msra.gmra.mxu0 %vm786_vm1, %v762_v54 }
 0x1d4   :  { %v824_v57 = vpop.f32.mrf.mxu0 }
 0x1d5   :  { %v825_v58 = vadd.f32 %v937_v56, %v824_v57 }
 0x1d6   :  { %v1040_v59 = vpop.f32.mrf.mxu0 }
 0x1d7   :  { %v831_v61 = vmax.f32 %v825_v58, 0.0 }
 0x1d8   :  { %v827_v62 = vpop.f32.mrf.mxu0 }
 0x1d9   :  { %v828_v63 = vadd.f32 %v937_v56, %v827_v62  ;;  %v840_v0 = vmul.f32 %v941_v60, %v831_v61 }
 0x1da   :  { %v1041_v1 = vpop.f32.mrf.mxu0 }
 0x1db   :  { %v832_v2 = vmax.f32 %v828_v63, 0.0  ;;  %v842_v3 = vsel %vm786_vm1, %v840_v0, 0.0 }
 0x1dc   :  { %843 = vadd.xlane.f32.xlu0 %v842_v3 }
 0x1dd   :  { %v841_v4 = vmul.f32 %v941_v60, %v832_v2 }
 0x1df   :  { %v845_v5 = vsel %vm786_vm1, %v841_v4, 0.0 }
 0x1e0   :  { %846 = vadd.xlane.f32.xlu0 %v845_v5 }
 0x265   :  { %v844_v7 = vpop.xlane.xlu0 %843 }
 0x266   :  { %v855_v8 = vadd.f32 %v942_v6, %v844_v7 }
 0x268   :  { %858 = vst.msk [vmem:[%s1402_s7] sm:$0xff] %vm857_vm2, %v855_v8 }
 0x269   :  { %v847_v9 = vpop.xlane.xlu0 %846 }
 0x26a   :  { %v856_v10 = vadd.f32 %v942_v6, %v847_v9 }
 0x26c   :  { %859 = vst.msk [vmem:[%s1402_s7 + $0x8] sm:$0xff] %vm857_vm2, %v856_v10 }

</bundles_post_ra>
